<compile_context>
chip_gen: v6e
topology: v6e:2x2x1
jax: 0.10.0
libtpu: 0.0.40
codegen_flags: <defaults>
</compile_context>

<pallas_src>
import functools

import jax
import jax.numpy as jnp
from jax.experimental import pallas as pl
from jax.experimental.pallas import tpu as pltpu

_LANE = 128
_COL_TILE = 1024   # lane-dense block width (multiple of 128)
_ROW_TILE = 256    # block rows (multiple of 8) -> 256*1024*4B = 1 MiB f32 block


def _round_up(x: int, m: int) -> int:
    return ((x + m - 1) // m) * m


def _ground_loss_kernel(h_ref, o_ref, *, a1, inv_a2, b1, inv_b2):
    # h_ref / o_ref: (row_tile, cols) lane-dense tiles in VMEM.
    h = h_ref[...].astype(jnp.float32)              # compute in f32 (bf16-safe)
    outside = h >= 0.0
    # One tanh per element (EUP slot), multiply by reciprocal constant instead
    # of dividing.  Exactly equal to pull + push since tanh(0) == 0.
    inv_alpha = jnp.where(outside, inv_a2, inv_b2)
    scale = jnp.where(outside, a1, b1)
    t = jnp.tanh(h * inv_alpha)
    o_ref[...] = (scale * t * t).astype(o_ref.dtype)


def ground_loss(
    vertices: jnp.ndarray,
    *,
    out_alpha1: float = 1.0,
    out_alpha2: float = 0.15,
    in_alpha1: float = 10.0,
    in_alpha2: float = 0.15,
) -> jnp.ndarray:
    """vertices: [B, V, 3] -> per-vertex ground loss [B, V]."""
    B, V, C = vertices.shape
    assert C == 3, "expected xyz vertices"

    # Layout plumbing in the wrapper: lane-dense heights, y channel only.
    heights = vertices[..., 1]                       # [B, V]
    total = B * V
    flat = heights.reshape(total)

    # Pick a (rows, cols) slab: cols is a large multiple of 128.
    if total >= _COL_TILE:
        cols = _COL_TILE
    else:
        cols = _round_up(total, _LANE)
    rows = pl.cdiv(total, cols)

    if rows <= _ROW_TILE:
        row_tile = rows                              # single row-block == full dim
        rows_padded = rows
    else:
        row_tile = _ROW_TILE
        rows_padded = _round_up(rows, _ROW_TILE)

    padded_total = rows_padded * cols
    if padded_total != total:
        flat = jnp.pad(flat, (0, padded_total - total))
    h2d = flat.reshape(rows_padded, cols)

    kernel = functools.partial(
        _ground_loss_kernel,
        a1=float(out_alpha1), inv_a2=float(1.0 / out_alpha2),
        b1=float(in_alpha1), inv_b2=float(1.0 / in_alpha2),
    )

    grid = (rows_padded // row_tile,)
    out2d = pl.pallas_call(
        kernel,
        out_shape=jax.ShapeDtypeStruct((rows_padded, cols), vertices.dtype),
        grid_spec=pl.GridSpec(
            grid=grid,
            in_specs=[pl.BlockSpec((row_tile, cols), lambda i: (i, 0))],
            out_specs=pl.BlockSpec((row_tile, cols), lambda i: (i, 0)),
        ),
        compiler_params=pltpu.CompilerParams(
            dimension_semantics=("parallel",),
            vmem_limit_bytes=32 * 1024 * 1024,
        ),
    )(h2d)

    return out2d.reshape(padded_total)[:total].reshape(B, V)


if __name__ == "__main__":
    key = jax.random.PRNGKey(0)
    B, V = 2, 6890   # SMPL-sized body mesh, 2 batches (~55 KiB of heights)
    vertices = jax.random.normal(key, (B, V, 3), dtype=jnp.float32)

    out = ground_loss(vertices)
    out = jax.block_until_ready(out)

    # Pure-jnp reference matching the PyTorch forward.
    a1, a2, b1, b2 = 1.0, 0.15, 10.0, 0.15
    h = vertices[:, :, 1]
    outside = (h >= 0.0).astype(h.dtype)
    inside = (h < 0.0).astype(h.dtype)
    ref = a1 * jnp.tanh(h * outside / a2) ** 2 + b1 * jnp.tanh(h * inside / b2) ** 2

    assert out.shape == (B, V)
    assert bool(jnp.isfinite(out).all())
    assert jnp.allclose(out, ref, rtol=1e-5, atol=1e-5), "mismatch vs reference"

    print("KERNEL_OK")
</pallas_src>

<mosaic_0001>
module attributes {stable_mosaic.version = 11 : i64} {
  func.func @_ground_loss_kernel(%arg0: i32, %arg1: memref<14x1024xf32, #tpu.memory_space<vmem>>, %arg2: memref<14x1024xf32, #tpu.memory_space<vmem>>) attributes {dimension_semantics = [#tpu.dimension_semantics<parallel>], iteration_bounds = array<i64: 1>, scalar_prefetch = 0 : i64, scratch_operands = 0 : i64, tpu.core_type = #tpu.core_type<tc>, window_params = [{transform_indices = @transform_0, window_bounds = array<i64: 14, 1024>}, {transform_indices = @transform_1, window_bounds = array<i64: 14, 1024>}]} {
    %c0 = arith.constant 0 : index
    %c0_0 = arith.constant 0 : index
    %0 = vector.load %arg1[%c0, %c0_0] : memref<14x1024xf32, #tpu.memory_space<vmem>>, vector<14x1024xf32>
    %cst = arith.constant 0.000000e+00 : f32
    %1 = vector.broadcast %cst : f32 to vector<14x1024xf32>
    %2 = arith.cmpf oge, %0, %1 : vector<14x1024xf32>
    %cst_1 = arith.constant 6.66666651 : f32
    %cst_2 = arith.constant 6.66666651 : f32
    %3 = vector.broadcast %cst_1 : f32 to vector<14x1024xf32>
    %4 = vector.broadcast %cst_2 : f32 to vector<14x1024xf32>
    %5 = arith.select %2, %3, %4 : vector<14x1024xi1>, vector<14x1024xf32>
    %cst_3 = arith.constant 1.000000e+00 : f32
    %cst_4 = arith.constant 1.000000e+01 : f32
    %6 = vector.broadcast %cst_3 : f32 to vector<14x1024xf32>
    %7 = vector.broadcast %cst_4 : f32 to vector<14x1024xf32>
    %8 = arith.select %2, %6, %7 : vector<14x1024xi1>, vector<14x1024xf32>
    %9 = arith.mulf %0, %5 : vector<14x1024xf32>
    %10 = math.tanh %9 : vector<14x1024xf32>
    %11 = arith.mulf %8, %10 : vector<14x1024xf32>
    %12 = arith.mulf %11, %10 : vector<14x1024xf32>
    %c0_5 = arith.constant 0 : index
    %c0_6 = arith.constant 0 : index
    %13 = vector.load %arg2[%c0_5, %c0_6] : memref<14x1024xf32, #tpu.memory_space<vmem>>, vector<14x1024xf32>
    tpu.vector_store %arg2[%c0_5, %c0_6], %12 {strides = array<i32>} : memref<14x1024xf32, #tpu.memory_space<vmem>>, vector<14x1024xf32>,
    return
  }
  func.func @transform_0(%arg0: i32) -> (i32, i32) {
    %c0_i32 = arith.constant 0 : i32
    %c0_i32_0 = arith.constant 0 : i32
    return %arg0, %c0_i32 : i32, i32
  }
  func.func @transform_1(%arg0: i32) -> (i32, i32) {
    %c0_i32 = arith.constant 0 : i32
    %c0_i32_0 = arith.constant 0 : i32
    return %arg0, %c0_i32 : i32, i32
  }
}

</mosaic_0001>

<bundles_post_ra>
// kernel: tpu_custom_call.1
= control target key start
LH: loop header
LB: loop body
LE: loop exit
PB: predicated region body
PF: predicated region fallthrough
CT: control target
= control target key end

     0   :  { %6 = vsyncpa [#allocation3], 0  ;;  %s348_s0 = inlined_call_operand.hbm [shape: f32[14,1024], index: 0, kind: input, shape index: {}]   ;;  %s349_s1 = inlined_call_operand.hbm [shape: f32[14,1024], index: 1, kind: output, shape index: {}]  }
   0x1   :  { %7 = vsyncpa [#allocation4], 0  ;;  %s249_s6 = smov [#allocation2]  }
   0x2   :  { %s13_s7 = sshll.u32 %s249_s6, 4  ;;  %s14_s7 = int_to_ptr.vmem [resolvable:$true] %s13_s7 }
   0x3   :  { %s213_s8 = scalar_lea.vmem %s14_s7, 2048  ;;  %p218_p1 = scmp.lt.s32.totalorder %s14_s7, %s14_s7 }
   0x4   :  { %p214_p0 = scmp.ne.s32.totalorder %s14_s7, %s213_s8  ;;  %p219_p2 = scmp.lt.s32.totalorder %s213_s8, %s213_s8 }
   0x6   :  { %p220_p3 = por %p219_p2, %p218_p1 }
   0x8   :  { %p221_p4 = pnand %p220_p3, %p214_p0 }
   0xa   :  { %224 = shalt.err (!%p221_p4)
}
   0xb   :  { %s250_s9 = smov 1024   ;;  %s251_s10 = smov 64  }
   0xc   :  { %19 = dma.hbm_to_vmem [thread:$0]  %s348_s0, 2048, %s14_s7, [#allocation3], %s250_s9, %s250_s9, %s251_s10  }
   0xd   :  { %245 = dma.done.wait [#allocation3], 2048  }
   0xe   :  { %246 = vsyncadd [#allocation3], 4294965248  ;;  %v23_v0 = vld [vmem:[#allocation2] sm:$0xff]  ;;  %v24_v1 = vld [vmem:[#allocation2 + $0x8] sm:$0xff]  ;;  %v252_v30 = vmov 10.0   ;;  %s253_s0 = smov [#allocation5]  }
   0xf   :  { %v25_v2 = vld [vmem:[#allocation2 + $0x10] sm:$0xff]  ;;  %v71_v3 = vmul.f32 6.6666665, %v23_v0  ;;  %v72_v4 = vmul.f32 6.6666665, %v24_v1  ;;  %v26_v6 = vld [vmem:[#allocation2 + $0x18] sm:$0xff] }
  0x10   :  { %v73_v5 = vmul.f32 6.6666665, %v25_v2  ;;  %v74_v7 = vmul.f32 6.6666665, %v26_v6  ;;  %v27_v8 = vld [vmem:[#allocation2 + $0x20] sm:$0xff]  ;;  %v28_v9 = vld [vmem:[#allocation2 + $0x28] sm:$0xff] }
  0x11   :  { %173 = vtanh.f32 %v71_v3  ;;  %v75_v10 = vmul.f32 6.6666665, %v27_v8  ;;  %v270_v11 = vld [vmem:[#allocation2 + $0x30] sm:$0xff]  ;;  %v272_v12 = vld [vmem:[#allocation2 + $0x38] sm:$0xff]  ;;  %v76_v13 = vmul.f32 6.6666665, %v28_v9 }
  0x12   :  { %175 = vtanh.f32 %v72_v4  ;;  %v274_v14 = vld [vmem:[#allocation2 + $0x40] sm:$0x3f]  ;;  %v77_v15 = vmul.f32 6.6666665, %v270_v11  ;;  %v277_v16 = vld [vmem:[#allocation2 + $0x48] sm:$0x3f] }
  0x13   :  { %177 = vtanh.f32 %v73_v5  ;;  %v78_v17 = vmul.f32 6.6666665, %v272_v12  ;;  %v280_v18 = vld [vmem:[#allocation2 + $0x50] sm:$0x3f]  ;;  %v79_v19 = vmul.f32 6.6666665, %v274_v14 }
  0x14   :  { %179 = vtanh.f32 %v74_v7  ;;  %v283_v20 = vld [vmem:[#allocation2 + $0x58] sm:$0x3f]  ;;  %v80_v21 = vmul.f32 6.6666665, %v277_v16  ;;  %v286_v22 = vld [vmem:[#allocation2 + $0x60] sm:$0x3f] }
  0x15   :  { %181 = vtanh.f32 %v75_v10  ;;  %v81_v23 = vmul.f32 6.6666665, %v280_v18  ;;  %v289_v24 = vld [vmem:[#allocation2 + $0x68] sm:$0x3f]  ;;  %vm39_vm0 = vcmp.ge.f32.partialorder %v23_v0, 0.0  ;;  %vm40_vm1 = vcmp.ge.f32.partialorder %v24_v1, 0.0 }
  0x16   :  { %183 = vtanh.f32 %v76_v13  ;;  %v82_v25 = vmul.f32 6.6666665, %v283_v20  ;;  %v292_v26 = vld [vmem:[#allocation2 + $0x70] sm:$0x3f]  ;;  %v83_v27 = vmul.f32 6.6666665, %v286_v22 }
  0x17   :  { %185 = vtanh.f32 %v77_v15  ;;  %v295_v28 = vld [vmem:[#allocation2 + $0x78] sm:$0x3f]  ;;  %vm41_vm2 = vcmp.ge.f32.partialorder %v25_v2, 0.0  ;;  %v84_v29 = vmul.f32 6.6666665, %v289_v24  ;;  %v55_v31 = vsel %vm39_vm0, 1.0, %v252_v30 }
  0x18   :  { %187 = vtanh.f32 %v78_v17  ;;  %vm42_vm3 = vcmp.ge.f32.partialorder %v26_v6, 0.0  ;;  %v85_v32 = vmul.f32 6.6666665, %v292_v26  ;;  %v56_v33 = vsel %vm40_vm1, 1.0, %v252_v30  ;;  %s156_s13 = sshll.u32 %s253_s0, 4  ;;  %s157_s13 = int_to_ptr.vmem [resolvable:$true] %s156_s13 }
  0x19   :  { %189 = vtanh.f32 %v79_v19  ;;  %vm43_vm4 = vcmp.ge.f32.partialorder %v27_v8, 0.0  ;;  %v86_v34 = vmul.f32 6.6666665, %v295_v28  ;;  %v57_v36 = vsel %vm41_vm2, 1.0, %v252_v30  ;;  %s225_s14 = scalar_lea.vmem %s157_s13, 2048  ;;  %p230_p6 = scmp.lt.s32.totalorder %s157_s13, %s157_s13 }
  0x1a   :  { %191 = vtanh.f32 %v80_v21  ;;  %vm44_vm5 = vcmp.ge.f32.partialorder %v28_v9, 0.0  ;;  %v58_v39 = vsel %vm42_vm3, 1.0, %v252_v30  ;;  %vm45_vm6 = vcmp.ge.f32.partialorder %v270_v11, 0.0  ;;  %p226_p5 = scmp.ne.s32.totalorder %s157_s13, %s225_s14  ;;  %p231_p7 = scmp.lt.s32.totalorder %s225_s14, %s225_s14 }
  0x1b   :  { %193 = vtanh.f32 %v81_v23  ;;  %v59_v42 = vsel %vm43_vm4, 1.0, %v252_v30  ;;  %vm46_vm7 = vcmp.ge.f32.partialorder %v272_v12, 0.0  ;;  %v60_v46 = vsel %vm44_vm5, 1.0, %v252_v30 }
  0x1c   :  { %195 = vtanh.f32 %v82_v25  ;;  %vm47_vm8 = vcmp.ge.f32.partialorder %v274_v14, 0.0  ;;  %v61_v50 = vsel %vm45_vm6, 1.0, %v252_v30  ;;  %vm48_vm9 = vcmp.ge.f32.partialorder %v277_v16, 0.0  ;;  %p232_p8 = por %p231_p7, %p230_p6 }
  0x1d   :  { %197 = vtanh.f32 %v83_v27  ;;  %v62_v54 = vsel %vm46_vm7, 1.0, %v252_v30  ;;  %vm49_vm10 = vcmp.ge.f32.partialorder %v280_v18, 0.0  ;;  %v63_v58 = vsel %vm47_vm8, 1.0, %v252_v30 }
  0x1e   :  { %v174_v35 = vpop.eup %173  ;;  %199 = vtanh.f32 %v84_v29  ;;  %vm50_vm11 = vcmp.ge.f32.partialorder %v283_v20, 0.0  ;;  %v64_v62 = vsel %vm48_vm9, 1.0, %v252_v30  ;;  %vm51_vm12 = vcmp.ge.f32.partialorder %v286_v22, 0.0  ;;  %p233_p9 = pnand %p232_p8, %p226_p5 }
  0x1f   :  { %v176_v37 = vpop.eup %175  ;;  %v103_v38 = vmul.f32 %v174_v35, %v55_v31  ;;  %201 = vtanh.f32 %v85_v32  ;;  %v65_v2 = vsel %vm49_vm10, 1.0, %v252_v30  ;;  %vm52_vm13 = vcmp.ge.f32.partialorder %v289_v24, 0.0 }
  0x20   :  { %v178_v40 = vpop.eup %177  ;;  %v104_v41 = vmul.f32 %v176_v37, %v56_v33  ;;  %203 = vtanh.f32 %v86_v34  ;;  %v66_v6 = vsel %vm50_vm11, 1.0, %v252_v30  ;;  %vm53_vm14 = vcmp.ge.f32.partialorder %v292_v26, 0.0 }
  0x21   :  { %v180_v43 = vpop.eup %179  ;;  %v119_v44 = vmul.f32 %v174_v35, %v103_v38  ;;  %v105_v45 = vmul.f32 %v178_v40, %v57_v36  ;;  %v67_v10 = vsel %vm51_vm12, 1.0, %v252_v30  ;;  %vm54_vm15 = vcmp.ge.f32.partialorder %v295_v28, 0.0 }
  0x22   :  { %v182_v47 = vpop.eup %181  ;;  %v120_v48 = vmul.f32 %v176_v37, %v104_v41  ;;  %v106_v49 = vmul.f32 %v180_v43, %v58_v39  ;;  %v68_v14 = vsel %vm52_vm13, 1.0, %v252_v30  ;;  %v69_v18 = vsel %vm53_vm14, 1.0, %v252_v30 }
  0x23   :  { %v184_v51 = vpop.eup %183  ;;  %135 = vst [vmem:[#allocation5] sm:$0xff] %v119_v44  ;;  %v121_v52 = vmul.f32 %v178_v40, %v105_v45  ;;  %v107_v53 = vmul.f32 %v182_v47, %v59_v42  ;;  %v70_v22 = vsel %vm54_vm15, 1.0, %v252_v30 }
  0x24   :  { %v186_v55 = vpop.eup %185  ;;  %136 = vst [vmem:[#allocation5 + $0x8] sm:$0xff] %v120_v48  ;;  %v122_v56 = vmul.f32 %v180_v43, %v106_v49  ;;  %v108_v57 = vmul.f32 %v184_v51, %v60_v46 }
  0x25   :  { %v188_v59 = vpop.eup %187  ;;  %137 = vst [vmem:[#allocation5 + $0x10] sm:$0xff] %v121_v52  ;;  %v123_v60 = vmul.f32 %v182_v47, %v107_v53  ;;  %v109_v61 = vmul.f32 %v186_v55, %v61_v50 }
  0x26   :  { %v190_v63 = vpop.eup %189  ;;  %138 = vst [vmem:[#allocation5 + $0x18] sm:$0xff] %v122_v56  ;;  %v124_v0 = vmul.f32 %v184_v51, %v108_v57  ;;  %v110_v1 = vmul.f32 %v188_v59, %v62_v54 }
  0x27   :  { %v192_v3 = vpop.eup %191  ;;  %139 = vst [vmem:[#allocation5 + $0x20] sm:$0xff] %v123_v60  ;;  %v125_v4 = vmul.f32 %v186_v55, %v109_v61  ;;  %v111_v5 = vmul.f32 %v190_v63, %v63_v58 }
  0x28   :  { %v194_v7 = vpop.eup %193  ;;  %140 = vst [vmem:[#allocation5 + $0x28] sm:$0xff] %v124_v0  ;;  %v126_v8 = vmul.f32 %v188_v59, %v110_v1  ;;  %v112_v9 = vmul.f32 %v192_v3, %v64_v62 }
  0x29   :  { %v196_v11 = vpop.eup %195  ;;  %141 = vst [vmem:[#allocation5 + $0x30] sm:$0xff] %v125_v4  ;;  %v127_v12 = vmul.f32 %v190_v63, %v111_v5  ;;  %v113_v13 = vmul.f32 %v194_v7, %v65_v2 }
  0x2a   :  { %v198_v15 = vpop.eup %197  ;;  %142 = vst [vmem:[#allocation5 + $0x38] sm:$0xff] %v126_v8  ;;  %v128_v16 = vmul.f32 %v192_v3, %v112_v9  ;;  %v114_v17 = vmul.f32 %v196_v11, %v66_v6 }
  0x2b   :  { %v200_v19 = vpop.eup %199  ;;  %143 = vst [vmem:[#allocation5 + $0x40] sm:$0x3f] %v127_v12  ;;  %v129_v20 = vmul.f32 %v194_v7, %v113_v13  ;;  %v115_v21 = vmul.f32 %v198_v15, %v67_v10 }
  0x2c   :  { %v202_v23 = vpop.eup %201  ;;  %144 = vst [vmem:[#allocation5 + $0x48] sm:$0x3f] %v128_v16  ;;  %v130_v25 = vmul.f32 %v196_v11, %v114_v17  ;;  %v116_v27 = vmul.f32 %v200_v19, %v68_v14 }
  0x2d   :  { %v204_v24 = vpop.eup %203  ;;  %145 = vst [vmem:[#allocation5 + $0x50] sm:$0x3f] %v129_v20  ;;  %v131_v28 = vmul.f32 %v198_v15, %v115_v21  ;;  %v117_v29 = vmul.f32 %v202_v23, %v69_v18 }
  0x2e   :  { %146 = vst [vmem:[#allocation5 + $0x58] sm:$0x3f] %v130_v25  ;;  %v132_v31 = vmul.f32 %v200_v19, %v116_v27  ;;  %v118_v26 = vmul.f32 %v204_v24, %v70_v22 }
  0x2f   :  { %147 = vst [vmem:[#allocation5 + $0x60] sm:$0x3f] %v131_v28  ;;  %v133_v32 = vmul.f32 %v202_v23, %v117_v29 }
  0x30   :  { %148 = vst [vmem:[#allocation5 + $0x68] sm:$0x3f] %v132_v31  ;;  %v134_v33 = vmul.f32 %v204_v24, %v118_v26 }
  0x31   :  { %149 = vst [vmem:[#allocation5 + $0x70] sm:$0x3f] %v133_v32 }
  0x32   :  { %150 = vst [vmem:[#allocation5 + $0x78] sm:$0x3f] %v134_v33 }
  0x33   :  { %236 = shalt.err (!%p233_p9)
}
  0x34   :  { %162 = dma.vmem_to_hbm [thread:$0]  %s157_s13, 2048, %s349_s1, [#allocation4], %s250_s9, %s250_s9, %s251_s10  }
  0x35   :  { %247 = dma.done.wait [#allocation4], 2048  }
  0x36   :  { %248 = vsyncadd [#allocation4], 4294965248 }
  0x37   :  { %166 = vsyncpa [#allocation3], 1 }
  0x38   :  { %167 = vsyncpa [#allocation4], 1 }

</bundles_post_ra>
